<compile_context>
chip_gen: v7x
topology: tpu7x:2x2x1
jax: 0.10.0
libtpu: 0.0.40
codegen_flags: <defaults>
</compile_context>

<pallas_src>
import numpy as np
import jax
import jax.numpy as jnp
from jax.experimental import pallas as pl
from jax.experimental.pallas import tpu as pltpu


_MAX_FULL_ROWS = 1024              # keep the whole row dim (B*C) in one block up to this
_ROW_TILE = 256                    # row tile (multiple of 8) used only when B*C is huge
_DEFAULT_TILE_ELEMS = 1024 * 1024  # ~4 MiB f32 per input tile
_MIN_LANE_TILE = 128


def _round_up(x, m):
    return (x + m - 1) // m * m


def _choose_lane_tile(L, budget):
    """Pick (tile_l, padded_L). tile_l is a multiple of 128, or the full lane dim."""
    if L <= budget:
        return L, L                       # whole lane dim in a single block
    l128 = _round_up(L, 128)
    d = budget                            # budget is a multiple of 128
    while d >= _MIN_LANE_TILE:
        if l128 % d == 0:
            break
        d -= 128
    if d >= 1024:                         # big enough divisor -> no lane padding needed
        return d, l128
    # Fallback: keep tiles big, accept some lane padding (masked in-kernel).
    return budget, _round_up(L, budget)


def _make_kernel(n_lanes, tile_l, lanes_padded, inv_n, multi_step):
    """Kernel factory closing over static shape / scaling info."""

    def _sq_err(pred_ref, true_ref, scale_ref, bias_ref, lane_block):
        # Cast on the loaded tile (no-op for f32 inputs, halves HBM traffic for bf16).
        pred = pred_ref[...].astype(jnp.float32)
        tru = true_ref[...].astype(jnp.float32)
        scale = scale_ref[...]            # (tile_r, 1) f32, = 1/std      (0 on padded rows)
        bias = bias_ref[...]              # (tile_r, 1) f32, = -mean/std  (0 on padded rows)
        diff = pred * scale + bias - tru  # channel-normalize prediction only
        sq = diff * diff
        if lanes_padded:
            lane_ids = lane_block * tile_l + jax.lax.broadcasted_iota(
                jnp.int32, (1, tile_l), 1)
            sq = jnp.where(lane_ids < n_lanes, sq, 0.0)
        return sq

    if not multi_step:
        # Whole problem in one tile: no scratch, no init/finalize branches.
        def kernel(pred_ref, true_ref, scale_ref, bias_ref, out_ref):
            sq = _sq_err(pred_ref, true_ref, scale_ref, bias_ref, 0)
            out_ref[...] = jnp.reshape(jnp.sum(sq) * jnp.float32(inv_n), (1, 1))
        return kernel

    def kernel(pred_ref, true_ref, scale_ref, bias_ref, out_ref, acc_ref):
        r = pl.program_id(0)
        l = pl.program_id(1)

        @pl.when((r == 0) & (l == 0))
        def _init():
            acc_ref[...] = jnp.zeros_like(acc_ref)

        # Elementwise accumulation every step (VPU only, hidden under HBM DMA);
        # the single cross-lane reduction happens once in the epilogue.
        acc_ref[...] = acc_ref[...] + _sq_err(pred_ref, true_ref,
                                              scale_ref, bias_ref, l)

        @pl.when((r == pl.num_programs(0) - 1) & (l == pl.num_programs(1) - 1))
        def _finalize():
            out_ref[...] = jnp.reshape(
                jnp.sum(acc_ref[...]) * jnp.float32(inv_n), (1, 1))

    return kernel


def image_loss(y_pred, y_true,
               mean=(0.485, 0.456, 0.406),
               std=(0.229, 0.224, 0.225),
               target_tile_elems=_DEFAULT_TILE_ELEMS):
    """Equivalent of ImageLoss().forward(y_pred, y_true). Inputs are NCHW."""
    assert y_pred.shape == y_true.shape, "pred/true shapes must match"
    B, C, H, W = y_pred.shape
    assert C == 3, "ImageLoss normalizes exactly 3 channels"

    R = B * C                      # rows of the slab (one row per (batch, channel))
    L = H * W                      # lanes of the slab
    N = R * L                      # MSE 'mean' denominator (unpadded)

    pred2d = y_pred.reshape(R, L)  # native dtype; cast happens in-kernel
    true2d = y_true.reshape(R, L)

    # ---- tiling -------------------------------------------------------------
    if R <= _MAX_FULL_ROWS:
        tile_r, r_pad = R, R       # full row dim in one block (no row padding)
    else:
        tile_r = _ROW_TILE
        r_pad = _round_up(R, tile_r)

    lane_budget = max(_MIN_LANE_TILE,
                      (target_tile_elems // max(tile_r, 1)) // 128 * 128)
    tile_l, l_pad = _choose_lane_tile(L, lane_budget)

    if (r_pad, l_pad) != (R, L):
        pred2d = jnp.pad(pred2d, ((0, r_pad - R), (0, l_pad - L)))
        true2d = jnp.pad(true2d, ((0, r_pad - R), (0, l_pad - L)))

    # ---- per-row normalization constants (channel = row % 3) ----------------
    mean_np = np.asarray(mean, np.float32)
    std_np = np.asarray(std, np.float32)
    rows = np.arange(r_pad)
    ch = rows % 3
    valid = rows < R
    scale_col = jnp.asarray(
        np.where(valid, 1.0 / std_np[ch], 0.0).astype(np.float32).reshape(r_pad, 1))
    bias_col = jnp.asarray(
        np.where(valid, -mean_np[ch] / std_np[ch], 0.0).astype(np.float32).reshape(r_pad, 1))

    grid = (r_pad // tile_r, l_pad // tile_l)
    multi_step = grid[0] * grid[1] > 1
    kernel = _make_kernel(n_lanes=L, tile_l=tile_l, lanes_padded=(l_pad > L),
                          inv_n=1.0 / N, multi_step=multi_step)

    itemsize = np.dtype(y_pred.dtype).itemsize
    cost = pl.CostEstimate(
        flops=5 * r_pad * l_pad,
        transcendentals=0,
        bytes_accessed=2 * r_pad * l_pad * itemsize + 8 * r_pad + 4)

    scratch = [pltpu.VMEM((tile_r, tile_l), jnp.float32)] if multi_step else []

    out = pl.pallas_call(
        kernel,
        out_shape=jax.ShapeDtypeStruct((1, 1), jnp.float32),
        grid=grid,
        in_specs=[
            pl.BlockSpec((tile_r, tile_l), lambda r, l: (r, l)),   # pred tile
            pl.BlockSpec((tile_r, tile_l), lambda r, l: (r, l)),   # true tile
            pl.BlockSpec((tile_r, 1), lambda r, l: (r, 0)),        # 1/std per row
            pl.BlockSpec((tile_r, 1), lambda r, l: (r, 0)),        # -mean/std per row
        ],
        out_specs=pl.BlockSpec((1, 1), lambda r, l: (0, 0)),       # resident scalar block
        scratch_shapes=scratch,
        compiler_params=pltpu.CompilerParams(
            dimension_semantics=("arbitrary", "arbitrary"),
            vmem_limit_bytes=32 * 1024 * 1024),
        cost_estimate=cost,
    )(pred2d, true2d, scale_col, bias_col)

    return out[0, 0]


def _reference_image_loss(y_pred, y_true,
                          mean=(0.485, 0.456, 0.406),
                          std=(0.229, 0.224, 0.225)):
    mean = jnp.asarray(mean, jnp.float32).reshape(1, 3, 1, 1)
    std = jnp.asarray(std, jnp.float32).reshape(1, 3, 1, 1)
    norm = (y_pred.astype(jnp.float32) - mean) / std
    return jnp.mean((norm - y_true.astype(jnp.float32)) ** 2)


if __name__ == "__main__":
    key = jax.random.PRNGKey(0)

    # 1) Small NCHW case (single-tile fast path).
    k1, k2, key = jax.random.split(key, 3)
    B, C, H, W = 2, 3, 16, 16
    y_pred = jax.random.uniform(k1, (B, C, H, W), dtype=jnp.float32)
    y_true = jax.random.uniform(k2, (B, C, H, W), dtype=jnp.float32)
    loss = image_loss(y_pred, y_true)
    jax.block_until_ready(loss)
    ref = _reference_image_loss(y_pred, y_true)
    assert jnp.allclose(loss, ref, rtol=1e-5, atol=1e-5), (loss, ref)

    # 2) Multi-step accumulator path (small tile budget forces a 2-block lane grid).
    k1, k2, key = jax.random.split(key, 3)
    y_pred = jax.random.uniform(k1, (2, 3, 32, 32), dtype=jnp.float32)
    y_true = jax.random.uniform(k2, (2, 3, 32, 32), dtype=jnp.float32)
    loss = image_loss(y_pred, y_true, target_tile_elems=4096)
    jax.block_until_ready(loss)
    ref = _reference_image_loss(y_pred, y_true)
    assert jnp.allclose(loss, ref, rtol=1e-5, atol=1e-5), (loss, ref)

    # 3) Lane-padding fallback + in-kernel mask + bf16 inputs.
    k1, k2, key = jax.random.split(key, 3)
    y_pred = jax.random.uniform(k1, (2, 3, 36, 32), dtype=jnp.float32).astype(jnp.bfloat16)
    y_true = jax.random.uniform(k2, (2, 3, 36, 32), dtype=jnp.float32).astype(jnp.bfloat16)
    loss = image_loss(y_pred, y_true, target_tile_elems=4096)
    jax.block_until_ready(loss)
    ref = _reference_image_loss(y_pred, y_true)
    assert jnp.allclose(loss, ref, rtol=1e-4, atol=1e-4), (loss, ref)

    print("KERNEL_OK")
</pallas_src>

<mosaic_0001>
module attributes {stable_mosaic.version = 11 : i64} {
  func.func @kernel(%arg0: i32, %arg1: i32, %arg2: memref<6x256xf32, #tpu.memory_space<vmem>>, %arg3: memref<6x256xf32, #tpu.memory_space<vmem>>, %arg4: memref<6x1xf32, #tpu.memory_space<vmem>>, %arg5: memref<6x1xf32, #tpu.memory_space<vmem>>, %arg6: memref<1x1xf32, #tpu.memory_space<vmem>>) attributes {dimension_semantics = [#tpu.dimension_semantics<arbitrary>, #tpu.dimension_semantics<arbitrary>], iteration_bounds = array<i64: 1, 1>, scalar_prefetch = 0 : i64, scratch_operands = 0 : i64, tpu.core_type = #tpu.core_type<tc>, window_params = [{transform_indices = @transform_0, window_bounds = array<i64: 6, 256>}, {transform_indices = @transform_1, window_bounds = array<i64: 6, 256>}, {transform_indices = @transform_2, window_bounds = array<i64: 6, 1>}, {transform_indices = @transform_3, window_bounds = array<i64: 6, 1>}, {pipeline_mode = #tpu.pipeline_mode<synchronous>, transform_indices = @transform_4, window_bounds = array<i64: 1, 1>}]} {
    %c0 = arith.constant 0 : index
    %c0_0 = arith.constant 0 : index
    %0 = vector.load %arg2[%c0, %c0_0] : memref<6x256xf32, #tpu.memory_space<vmem>>, vector<6x256xf32>
    %c0_1 = arith.constant 0 : index
    %c0_2 = arith.constant 0 : index
    %1 = vector.load %arg3[%c0_1, %c0_2] : memref<6x256xf32, #tpu.memory_space<vmem>>, vector<6x256xf32>
    %c0_3 = arith.constant 0 : index
    %c0_4 = arith.constant 0 : index
    %2 = vector.load %arg4[%c0_3, %c0_4] : memref<6x1xf32, #tpu.memory_space<vmem>>, vector<6x1xf32>
    %c0_5 = arith.constant 0 : index
    %c0_6 = arith.constant 0 : index
    %3 = vector.load %arg5[%c0_5, %c0_6] : memref<6x1xf32, #tpu.memory_space<vmem>>, vector<6x1xf32>
    %4 = vector.broadcast %2 : vector<6x1xf32> to vector<6x256xf32>
    %5 = arith.mulf %0, %4 : vector<6x256xf32>
    %6 = vector.broadcast %3 : vector<6x1xf32> to vector<6x256xf32>
    %7 = arith.addf %5, %6 : vector<6x256xf32>
    %8 = arith.subf %7, %1 : vector<6x256xf32>
    %9 = arith.mulf %8, %8 : vector<6x256xf32>
    %10 = vector.shape_cast %9 : vector<6x256xf32> to vector<1x6x256xf32>
    %cst = arith.constant dense<0.000000e+00> : vector<1xf32>
    %11 = vector.multi_reduction <add>, %10, %cst [1, 2] : vector<1x6x256xf32> to vector<1xf32>
    %12 = vector.shape_cast %11 : vector<1xf32> to vector<1x1x1xf32>
    %13 = vector.extract %12[0, 0, 0] : f32 from vector<1x1x1xf32>
    %cst_7 = arith.constant 6.51041686E-4 : f32
    %14 = arith.mulf %13, %cst_7 : f32
    %15 = vector.broadcast %14 : f32 to vector<1x1xf32>
    %c0_8 = arith.constant 0 : index
    %c0_9 = arith.constant 0 : index
    %16 = vector.load %arg6[%c0_8, %c0_9] : memref<1x1xf32, #tpu.memory_space<vmem>>, vector<1x1xf32>
    tpu.vector_store %arg6[%c0_8, %c0_9], %15 {strides = array<i32>} : memref<1x1xf32, #tpu.memory_space<vmem>>, vector<1x1xf32>,
    return
  }
  func.func @transform_0(%arg0: i32, %arg1: i32) -> (i32, i32) {
    %c0_i32 = arith.constant 0 : i32
    return %arg0, %arg1 : i32, i32
  }
  func.func @transform_1(%arg0: i32, %arg1: i32) -> (i32, i32) {
    %c0_i32 = arith.constant 0 : i32
    return %arg0, %arg1 : i32, i32
  }
  func.func @transform_2(%arg0: i32, %arg1: i32) -> (i32, i32) {
    %c0_i32 = arith.constant 0 : i32
    %c0_i32_0 = arith.constant 0 : i32
    return %arg0, %c0_i32 : i32, i32
  }
  func.func @transform_3(%arg0: i32, %arg1: i32) -> (i32, i32) {
    %c0_i32 = arith.constant 0 : i32
    %c0_i32_0 = arith.constant 0 : i32
    return %arg0, %c0_i32 : i32, i32
  }
  func.func @transform_4(%arg0: i32, %arg1: i32) -> (i32, i32) {
    %c0_i32 = arith.constant 0 : i32
    %c0_i32_0 = arith.constant 0 : i32
    %c0_i32_1 = arith.constant 0 : i32
    return %c0_i32, %c0_i32_0 : i32, i32
  }
}

</mosaic_0001>

<bundles_post_ra>
// kernel: tpu_custom_call.1
= control target key start
LH: loop header
LB: loop body
LE: loop exit
PB: predicated region body
PF: predicated region fallthrough
CT: control target
= control target key end

     0   :  { %9 = vsyncpa [#allocation3], 0  ;;  %s204_s0 = inlined_call_operand.vmem [shape: f32[6,256], index: 0, kind: input, shape index: {}]   ;;  %s205_s1 = inlined_call_operand.hbm [shape: f32[6,256], index: 1, kind: input, shape index: {}]   ;;  %s206_s2 = inlined_call_operand.vmem [shape: f32[6,1], index: 2, kind: input, shape index: {}]   ;;  %s207_s3 = inlined_call_operand.vmem [shape: f32[6,1], index: 3, kind: input, shape index: {}]   ;;  %s208_s4 = inlined_call_operand.hbm [shape: f32[1,1], index: 4, kind: output, shape index: {}]  }
   0x1   :  { %10 = vsyncpa [#allocation4], 0  ;;  %s140_s15 = smov [#allocation2]   ;;  %s92_s19 = scalar_lea.hbm %s205_s1, 256 }
   0x2   :  { %s19_s16 = sshll.u32 %s140_s15, 4  ;;  %p93_p0 = scmp.ne.s32.totalorder %s205_s1, %s92_s19  ;;  %s20_s16 = int_to_ptr.vmem [resolvable:$true] %s19_s16 }
   0x3   :  { %p96_p1 = scmp.lt.u32.totalorder %s92_s19, %s205_s1 }
   0x5   :  { %p98_p2 = pnand %p96_p1, %p93_p0 }
   0x7   :  { %101 = shalt.err (!%p98_p2)
}
   0x8   :  { %s102_s24 = scalar_lea.vmem %s20_s16, 256  ;;  %p107_p4 = scmp.lt.s32.totalorder %s20_s16, %s20_s16 }
   0x9   :  { %p103_p3 = scmp.ne.s32.totalorder %s20_s16, %s102_s24  ;;  %p108_p5 = scmp.lt.s32.totalorder %s102_s24, %s102_s24 }
   0xb   :  { %p109_p6 = por %p108_p5, %p107_p4 }
   0xd   :  { %p110_p7 = pnand %p109_p6, %p103_p3 }
   0xf   :  { %113 = shalt.err (!%p110_p7)
}
  0x10   :  { %22 = dma.hbm_to_vmem [thread:$0]  %s205_s1, 256, %s20_s16, [#allocation3]  }
  0x11   :  { %136 = dma.done.wait [#allocation3], 256  }
  0x12   :  { %137 = vsyncadd [#allocation3], 4294967040  ;;  %v141_v0 = vmov 0   ;;  %v34_v1 = vld [vmem:[%s206_s2] sm:$0x3f]  ;;  %vm54_vm0 = vcmask 1045504  }
  0x13   :  { %91 = vset.pattern.permute.xlu0 %v141_v0  ;;  %v35_v2 = vld [vmem:[%s207_s3] sm:$0x3f]  ;;  %v31_v5 = vld [vmem:[%s204_s0 + $0x8] sm:$0x3f]  ;;  %vm69_vm1 = vcmask 0  }
  0x14   :  { %38 = vperm.xlu0 %91, %v34_v1   ;;  %v30_v4 = vld [vmem:[%s204_s0] sm:$0x3f]  ;;  %v33_v10 = vld [vmem:[#allocation2 + $0x8] sm:$0x3f]  ;;  %s142_s0 = smov [#allocation5]  }
  0x15   :  { %v32_v9 = vld [vmem:[#allocation2] sm:$0x3f]  ;;  %s77_s2 = sshll.u32 %s142_s0, 4  ;;  %s78_s2 = int_to_ptr.vmem [resolvable:$true] %s77_s2 }
  0x16   :  { %s114_s9 = scalar_lea.vmem %s78_s2, 16  ;;  %s118_s10 = scalar_lea.vmem %s78_s2, 32 }
  0x17   :  { %p115_p8 = scmp.ne.s32.totalorder %s78_s2, %s114_s9  ;;  %p119_p9 = scmp.lt.s32.totalorder %s78_s2, %s78_s2 }
  0x18   :  { %45 = vperm.xlu0 %91, %v35_v2   ;;  %p120_p10 = scmp.lt.s32.totalorder %s118_s10, %s114_s9 }
  0x1a   :  { %p121_p11 = por %p120_p10, %p119_p9 }
  0x1c   :  { %p122_p12 = pnand %p121_p11, %p115_p8 }
  0x93   :  { %v39_v3 = vpop.permute.xlu0 %38 }
  0x94   :  { %v41_v6 = vmul.f32 %v39_v3, %v30_v4  ;;  %v42_v7 = vmul.f32 %v39_v3, %v31_v5 }
  0x97   :  { %v46_v8 = vpop.permute.xlu0 %45 }
  0x98   :  { %v48_v11 = vadd.f32 %v46_v8, %v41_v6  ;;  %v49_v12 = vadd.f32 %v46_v8, %v42_v7 }
  0x9a   :  { %v50_v13 = vsub.f32 %v48_v11, %v32_v9  ;;  %v51_v14 = vsub.f32 %v49_v12, %v33_v10 }
  0x9c   :  { %v52_v15 = vmul.f32 %v50_v13, %v50_v13  ;;  %v53_v16 = vmul.f32 %v51_v14, %v51_v14 }
  0x9e   :  { %v55_v17 = vsel %vm54_vm0, %v52_v15, 0.0  ;;  %v56_v18 = vsel %vm54_vm0, %v53_v16, 0.0 }
  0x9f   :  { %v57_v19 = vadd.f32 %v56_v18, %v55_v17 }
  0xa1   :  { %58 = vadd.xlane.f32.xlu1 %v57_v19 }
 0x12e   :  { %v59_v20 = vpop.xlane.xlu1 %58 }
 0x12f   :  { %v60_v21 = vrot.slane %v59_v20, 4 }
 0x131   :  { %v61_v22 = vadd.f32 %v60_v21, %v59_v20 }
 0x133   :  { %v62_v23 = vrot.slane %v61_v22, 2 }
 0x135   :  { %v63_v24 = vadd.f32 %v62_v23, %v61_v22 }
 0x137   :  { %v64_v25 = vrot.slane %v63_v24, 1 }
 0x139   :  { %v65_v26 = vadd.f32 %v64_v25, %v63_v24 }
 0x13b   :  { %86 = vpush %v65_v26 }
 0x16c   :  { %s87_s3 = spop %86 }
 0x16d   :  { %s67_s8 = smul.f32 0.0006510417, %s87_s3 }
 0x16f   :  { %v68_v27 = vstv %s67_s8 }
 0x170   :  { %70 = vst.msk [vmem:[#allocation5] sm:$0x1] %vm69_vm1, %v68_v27 }
 0x171   :  { %125 = shalt.err (!%p122_p12)
}
 0x172   :  { %s126_s13 = scalar_lea.hbm %s208_s4, 16 }
 0x173   :  { %p127_p13 = scmp.ne.s32.totalorder %s208_s4, %s126_s13  ;;  %p130_p0 = scmp.lt.u32.totalorder %s126_s13, %s208_s4 }
 0x175   :  { %p132_p1 = pnand %p130_p0, %p127_p13 }
 0x177   :  { %135 = shalt.err (!%p132_p1)
}
 0x178   :  { %80 = dma.vmem_to_hbm [thread:$0]  %s78_s2, 16, %s208_s4, [#allocation4]  }
 0x179   :  { %138 = dma.done.wait [#allocation4], 16  }
 0x17a   :  { %139 = vsyncadd [#allocation4], 4294967280 }
 0x17b   :  { %84 = vsyncpa [#allocation3], 1 }
 0x17c   :  { %85 = vsyncpa [#allocation4], 1 }

</bundles_post_ra>
